<compile_context>
chip_gen: v5e
topology: v5e:2x2
jax: 0.10.0
libtpu: 0.0.40
codegen_flags: <defaults>
</compile_context>

<pallas_src>
import jax
import jax.numpy as jnp
from jax.experimental import pallas as pl
from jax.experimental.pallas import tpu as pltpu


def _round_up(n, m):
    return (n + m - 1) // m * m


def _make_mlp_kernel(precision):
    """Kernel factory; `precision` controls MXU pass count for f32 inputs."""

    def _mlp_kernel(x_ref, w1_ref, b1_ref, w2_ref, b2_ref, w3_ref, b3_ref, o_ref):
        # x_ref : (24, TB)   -- batch on lanes
        # w1_ref: (H, 24)    b1_ref: (H, 1)
        # w2_ref: (H, H)     b2_ref: (H, 1)
        # w3_ref: (H, 1)     b3_ref: SMEM (1,)
        # o_ref : (1, TB)
        x = x_ref[...]

        # Layer 1: (H, 24) @ (24, TB) -> (H, TB); f32 accumulate, bias + ReLU in f32.
        h1 = jnp.dot(w1_ref[...], x, preferred_element_type=jnp.float32,
                     precision=precision) + b1_ref[...]
        h1 = jnp.maximum(h1, 0.0)

        # Layer 2: (H, H) @ (H, TB) -> (H, TB).
        h2 = jnp.dot(w2_ref[...], h1.astype(w2_ref.dtype),
                     preferred_element_type=jnp.float32,
                     precision=precision) + b2_ref[...]
        h2 = jnp.maximum(h2, 0.0)

        # Layer 3 (out_features = 1): VPU multiply + XLU sublane reduce instead
        # of a wasteful M=1 MXU matmul; scalar bias read from SMEM.
        h3 = jnp.sum(h2 * w3_ref[...].astype(jnp.float32), axis=0, keepdims=True)
        h3 = h3 + b3_ref[0]

        o_ref[...] = jnp.maximum(h3, 0.0).astype(o_ref.dtype)

    return _mlp_kernel


def prepare_params(params, dtype=jnp.bfloat16):
    """One-time conversion from PyTorch (out, in) layout to kernel layout.

    params: w1 (H, 24), b1 (H,), w2 (H, H), b2 (H,), w3 (1, H), b3 (1,)
    dtype:  wire/MXU dtype for x / w1 / w2 (bf16 default: kernel is HBM-bound
            and MXU eats bf16 natively on v5e/v6e/v7x).  Biases, the final
            layer weight column and all accumulation stay f32.  Pass
            dtype=jnp.float32 for exact fp32 parity with the PyTorch module.
    """
    H = params["w1"].shape[0]
    return {
        "w1": jnp.asarray(params["w1"], dtype),                    # (H, 24)
        "b1": jnp.asarray(params["b1"], jnp.float32).reshape(H, 1),  # (H, 1)
        "w2": jnp.asarray(params["w2"], dtype),                    # (H, H)
        "b2": jnp.asarray(params["b2"], jnp.float32).reshape(H, 1),  # (H, 1)
        "w3": jnp.asarray(params["w3"], jnp.float32).reshape(H, 1),  # (H, 1) column
        "b3": jnp.asarray(params["b3"], jnp.float32).reshape(1),     # (1,) scalar
    }


def no_thanks_nn_forward(x, prepared, *, block_b=16384):
    """Forward pass matching NoThanksNN.forward.

    x:        (B, ...) with prod(...) == 24 (flattened like nn.Flatten()).
    prepared: output of prepare_params().
    returns:  (B, 1) float32
    """
    B = x.shape[0]
    x_flat = x.reshape(B, -1)
    assert x_flat.shape[1] == 24, "NoThanksNN expects 24 input features"
    H = prepared["w1"].shape[0]
    in_dtype = prepared["w1"].dtype

    # Batch on the lane axis: (24, B).  Cast to the wire dtype *before* the
    # transpose so the transposed copy (and the pad fused into it) is half-size
    # on the default bf16 path.
    # TODO(synk): store/accept activations pre-transposed as (24, B) to remove
    # this extra HBM pass over x entirely.
    x_t = x_flat.astype(in_dtype).T

    # Pad batch to a lane-aligned multiple of the batch tile.
    B_pad = _round_up(max(B, 1), 128)
    tb = min(_round_up(block_b, 128), B_pad)
    # Keep >= 2 grid steps once the batch is big enough that the extra ~0.35us
    # per-step overhead is negligible, so v7x's two TensorCores both get work.
    if B_pad // tb < 2 and B_pad >= 2048:
        tb = _round_up((B_pad + 1) // 2, 128)
    B_pad = _round_up(B_pad, tb)
    if B_pad != B:
        x_t = jnp.pad(x_t, ((0, 0), (0, B_pad - B)))

    grid = (B_pad // tb,)

    precision = jax.lax.Precision.HIGHEST if in_dtype == jnp.float32 else None
    kernel = _make_mlp_kernel(precision)

    in_bytes = jnp.dtype(in_dtype).itemsize
    cost = pl.CostEstimate(
        flops=2 * B_pad * (24 * H + H * H + H),
        transcendentals=0,
        bytes_accessed=(B_pad * 24 * in_bytes                # x
                        + B_pad * 4                          # output
                        + (24 * H + H * H) * in_bytes        # w1, w2
                        + (3 * H + 1) * 4),                  # b1, b2, w3, b3
    )

    out = pl.pallas_call(
        kernel,
        out_shape=jax.ShapeDtypeStruct((1, B_pad), jnp.float32),
        grid=grid,
        in_specs=[
            pl.BlockSpec((24, tb), lambda i: (0, i)),    # x tile (double-buffered)
            pl.BlockSpec((H, 24), lambda i: (0, 0)),     # w1 (VMEM-resident)
            pl.BlockSpec((H, 1), lambda i: (0, 0)),      # b1 (resident)
            pl.BlockSpec((H, H), lambda i: (0, 0)),      # w2 (resident)
            pl.BlockSpec((H, 1), lambda i: (0, 0)),      # b2 (resident)
            pl.BlockSpec((H, 1), lambda i: (0, 0)),      # w3 column (resident)
            pl.BlockSpec(memory_space=pltpu.MemorySpace.SMEM),  # b3 scalar
        ],
        out_specs=pl.BlockSpec((1, tb), lambda i: (0, i)),
        compiler_params=pltpu.CompilerParams(
            dimension_semantics=("parallel",),           # megacore split on v7x
            vmem_limit_bytes=48 * 1024 * 1024,           # explicit budget; safe on v7x
        ),
        cost_estimate=cost,
    )(x_t, prepared["w1"], prepared["b1"], prepared["w2"], prepared["b2"],
      prepared["w3"], prepared["b3"])

    # (1, B_pad) -> (B, 1).  Keep this slice: padded batch columns carry
    # bias-propagated garbage by design.
    return out[:, :B].T


def init_params(key, n_hidden):
    """Deterministic parameter init (shapes match nn.Linear's (out, in) convention)."""
    k1, k2, k3, k4, k5, k6 = jax.random.split(key, 6)

    def lin_init(kw, kb, fan_in, fan_out):
        bound = 1.0 / jnp.sqrt(fan_in)
        w = jax.random.uniform(kw, (fan_out, fan_in), jnp.float32, -bound, bound)
        b = jax.random.uniform(kb, (fan_out,), jnp.float32, -bound, bound)
        return w, b

    w1, b1 = lin_init(k1, k2, 24, n_hidden)
    w2, b2 = lin_init(k3, k4, n_hidden, n_hidden)
    w3, b3 = lin_init(k5, k6, n_hidden, 1)
    return {"w1": w1, "b1": b1, "w2": w2, "b2": b2, "w3": w3, "b3": b3}


def _reference_forward(x, params):
    """Plain-JAX fp32 reference mirroring the PyTorch semantics."""
    B = x.shape[0]
    x = x.reshape(B, -1).astype(jnp.float32)
    h = jnp.maximum(x @ params["w1"].T + params["b1"], 0.0)
    h = jnp.maximum(h @ params["w2"].T + params["b2"], 0.0)
    h = jnp.maximum(h @ params["w3"].T + params["b3"], 0.0)
    return h


if __name__ == "__main__":
    key = jax.random.PRNGKey(0)
    k_params, k_x1, k_x2 = jax.random.split(key, 3)

    n_hidden = 32
    params = init_params(k_params, n_hidden)

    # One-time weight prep (hoisted): bf16 wire dtype (default) and exact f32.
    prepared_bf16 = prepare_params(params)                   # default: bf16
    prepared_f32 = prepare_params(params, dtype=jnp.float32)

    fwd = jax.jit(no_thanks_nn_forward, static_argnames=("block_b",))

    # Primary check: input (batch, 4, 6) -> Flatten -> (batch, 24).
    x = jax.random.normal(k_x1, (2, 4, 6), dtype=jnp.float32)
    ref = _reference_forward(x, params)

    out_f32 = jax.block_until_ready(fwd(x, prepared_f32))
    assert out_f32.shape == (2, 1)
    assert jnp.allclose(out_f32, ref, atol=1e-4, rtol=1e-4), "f32 mismatch vs reference"

    out_bf16 = jax.block_until_ready(fwd(x, prepared_bf16))
    assert out_bf16.shape == (2, 1)
    assert jnp.allclose(out_bf16, ref, atol=1e-1, rtol=1e-1), "bf16 mismatch vs reference"

    # Secondary check: exercise a multi-step batch grid (padding + resident weights).
    x2 = jax.random.normal(k_x2, (260, 4, 6), dtype=jnp.float32)
    ref2 = _reference_forward(x2, params)
    out2 = jax.block_until_ready(fwd(x2, prepared_f32, block_b=128))
    assert out2.shape == (260, 1)
    assert jnp.allclose(out2, ref2, atol=1e-4, rtol=1e-4), "f32 grid mismatch vs reference"

    print("KERNEL_OK")
</pallas_src>

<mosaic_0001>
module attributes {stable_mosaic.version = 11 : i64} {
  func.func @_mlp_kernel(%arg0: i32, %arg1: memref<24x128xf32, #tpu.memory_space<vmem>>, %arg2: memref<32x24xf32, #tpu.memory_space<vmem>>, %arg3: memref<32x1xf32, #tpu.memory_space<vmem>>, %arg4: memref<32x32xf32, #tpu.memory_space<vmem>>, %arg5: memref<32x1xf32, #tpu.memory_space<vmem>>, %arg6: memref<32x1xf32, #tpu.memory_space<vmem>>, %arg7: memref<1xf32, #tpu.memory_space<smem>>, %arg8: memref<1x128xf32, #tpu.memory_space<vmem>>) attributes {dimension_semantics = [#tpu.dimension_semantics<parallel>], iteration_bounds = array<i64: 1>, scalar_prefetch = 0 : i64, scratch_operands = 0 : i64, tpu.core_type = #tpu.core_type<tc>, window_params = [{transform_indices = @transform_0, window_bounds = array<i64: 24, 128>}, {pipeline_mode = #tpu.pipeline_mode<synchronous>, transform_indices = @transform_1, window_bounds = array<i64: 32, 24>}, {pipeline_mode = #tpu.pipeline_mode<synchronous>, transform_indices = @transform_2, window_bounds = array<i64: 32, 1>}, {pipeline_mode = #tpu.pipeline_mode<synchronous>, transform_indices = @transform_3, window_bounds = array<i64: 32, 32>}, {pipeline_mode = #tpu.pipeline_mode<synchronous>, transform_indices = @transform_4, window_bounds = array<i64: 32, 1>}, {pipeline_mode = #tpu.pipeline_mode<synchronous>, transform_indices = @transform_5, window_bounds = array<i64: 32, 1>}, {transform_indices = @transform_6, window_bounds = array<i64: 1>}, {transform_indices = @transform_7, window_bounds = array<i64: 1, 128>}]} {
    %c0 = arith.constant 0 : index
    %c0_0 = arith.constant 0 : index
    %0 = vector.load %arg1[%c0, %c0_0] : memref<24x128xf32, #tpu.memory_space<vmem>>, vector<24x128xf32>
    %c0_1 = arith.constant 0 : index
    %c0_2 = arith.constant 0 : index
    %1 = vector.load %arg2[%c0_1, %c0_2] : memref<32x24xf32, #tpu.memory_space<vmem>>, vector<32x24xf32>
    %cst = arith.constant dense<0.000000e+00> : vector<32x128xf32>
    %2 = tpu.matmul %1, %0, %cst {dimension_numbers = #tpu.dot_dimension_numbers<[1], [0], [0], [1], [0, 0, 1, 1], [], []>, precision = #tpu.contract_precision<fp32>} : vector<32x24xf32>, vector<24x128xf32>, vector<32x128xf32> -> vector<32x128xf32>
    %c0_3 = arith.constant 0 : index
    %c0_4 = arith.constant 0 : index
    %3 = vector.load %arg3[%c0_3, %c0_4] : memref<32x1xf32, #tpu.memory_space<vmem>>, vector<32x1xf32>
    %4 = vector.broadcast %3 : vector<32x1xf32> to vector<32x128xf32>
    %5 = arith.addf %2, %4 : vector<32x128xf32>
    %cst_5 = arith.constant 0.000000e+00 : f32
    %6 = vector.broadcast %cst_5 : f32 to vector<32x128xf32>
    %7 = arith.maximumf %5, %6 : vector<32x128xf32>
    %c0_6 = arith.constant 0 : index
    %c0_7 = arith.constant 0 : index
    %8 = vector.load %arg4[%c0_6, %c0_7] : memref<32x32xf32, #tpu.memory_space<vmem>>, vector<32x32xf32>
    %cst_8 = arith.constant dense<0.000000e+00> : vector<32x128xf32>
    %9 = tpu.matmul %8, %7, %cst_8 {dimension_numbers = #tpu.dot_dimension_numbers<[1], [0], [0], [1], [0, 0, 1, 1], [], []>, precision = #tpu.contract_precision<fp32>} : vector<32x32xf32>, vector<32x128xf32>, vector<32x128xf32> -> vector<32x128xf32>
    %c0_9 = arith.constant 0 : index
    %c0_10 = arith.constant 0 : index
    %10 = vector.load %arg5[%c0_9, %c0_10] : memref<32x1xf32, #tpu.memory_space<vmem>>, vector<32x1xf32>
    %11 = vector.broadcast %10 : vector<32x1xf32> to vector<32x128xf32>
    %12 = arith.addf %9, %11 : vector<32x128xf32>
    %cst_11 = arith.constant 0.000000e+00 : f32
    %13 = vector.broadcast %cst_11 : f32 to vector<32x128xf32>
    %14 = arith.maximumf %12, %13 : vector<32x128xf32>
    %c0_12 = arith.constant 0 : index
    %c0_13 = arith.constant 0 : index
    %15 = vector.load %arg6[%c0_12, %c0_13] : memref<32x1xf32, #tpu.memory_space<vmem>>, vector<32x1xf32>
    %16 = vector.broadcast %15 : vector<32x1xf32> to vector<32x128xf32>
    %17 = arith.mulf %14, %16 : vector<32x128xf32>
    %cst_14 = arith.constant dense<0.000000e+00> : vector<128xf32>
    %18 = vector.multi_reduction <add>, %17, %cst_14 [0] : vector<32x128xf32> to vector<128xf32>
    %19 = vector.shape_cast %18 : vector<128xf32> to vector<1x128xf32>
    %c0_15 = arith.constant 0 : index
    %20 = memref.load %arg7[%c0_15] : memref<1xf32, #tpu.memory_space<smem>>
    %21 = vector.broadcast %20 : f32 to vector<1x128xf32>
    %22 = arith.addf %19, %21 : vector<1x128xf32>
    %cst_16 = arith.constant 0.000000e+00 : f32
    %23 = vector.broadcast %cst_16 : f32 to vector<1x128xf32>
    %24 = arith.maximumf %22, %23 : vector<1x128xf32>
    %c0_17 = arith.constant 0 : index
    %c0_18 = arith.constant 0 : index
    %25 = vector.load %arg8[%c0_17, %c0_18] : memref<1x128xf32, #tpu.memory_space<vmem>>, vector<1x128xf32>
    tpu.vector_store %arg8[%c0_17, %c0_18], %24 {strides = array<i32>} : memref<1x128xf32, #tpu.memory_space<vmem>>, vector<1x128xf32>,
    return
  }
  func.func @transform_0(%arg0: i32) -> (i32, i32) {
    %c0_i32 = arith.constant 0 : i32
    %c0_i32_0 = arith.constant 0 : i32
    return %c0_i32, %arg0 : i32, i32
  }
  func.func @transform_1(%arg0: i32) -> (i32, i32) {
    %c0_i32 = arith.constant 0 : i32
    %c0_i32_0 = arith.constant 0 : i32
    %c0_i32_1 = arith.constant 0 : i32
    return %c0_i32, %c0_i32_0 : i32, i32
  }
  func.func @transform_2(%arg0: i32) -> (i32, i32) {
    %c0_i32 = arith.constant 0 : i32
    %c0_i32_0 = arith.constant 0 : i32
    %c0_i32_1 = arith.constant 0 : i32
    return %c0_i32, %c0_i32_0 : i32, i32
  }
  func.func @transform_3(%arg0: i32) -> (i32, i32) {
    %c0_i32 = arith.constant 0 : i32
    %c0_i32_0 = arith.constant 0 : i32
    %c0_i32_1 = arith.constant 0 : i32
    return %c0_i32, %c0_i32_0 : i32, i32
  }
  func.func @transform_4(%arg0: i32) -> (i32, i32) {
    %c0_i32 = arith.constant 0 : i32
    %c0_i32_0 = arith.constant 0 : i32
    %c0_i32_1 = arith.constant 0 : i32
    return %c0_i32, %c0_i32_0 : i32, i32
  }
  func.func @transform_5(%arg0: i32) -> (i32, i32) {
    %c0_i32 = arith.constant 0 : i32
    %c0_i32_0 = arith.constant 0 : i32
    %c0_i32_1 = arith.constant 0 : i32
    return %c0_i32, %c0_i32_0 : i32, i32
  }
  func.func @transform_6(%arg0: i32) -> i32 {
    %c0_i32 = arith.constant 0 : i32
    %c0_i32_0 = arith.constant 0 : i32
    return %c0_i32 : i32
  }
  func.func @transform_7(%arg0: i32) -> (i32, i32) {
    %c0_i32 = arith.constant 0 : i32
    %c0_i32_0 = arith.constant 0 : i32
    return %c0_i32, %arg0 : i32, i32
  }
}

</mosaic_0001>

<bundles_post_ra>
// kernel: no_thanks_nn_forward.1
= control target key start
LH: loop header
LB: loop body
LE: loop exit
PB: predicated region body
PF: predicated region fallthrough
CT: control target
= control target key end

     0   :  { %vm58_vm0 = vcmask 195584   ;;  %v713_v3 = vmov 0   ;;  %vm368_vm1 = vcmask 261120   ;;  %s909_s0 = inlined_call_operand.vmem [shape: f32[24,128], index: 0, kind: input, shape index: {}]   ;;  %s910_s1 = inlined_call_operand.vmem [shape: f32[32,24], index: 1, kind: input, shape index: {}]   ;;  %s911_s2 = inlined_call_operand.vmem [shape: f32[32,1], index: 2, kind: input, shape index: {}]   ;;  %s912_s4 = inlined_call_operand.vmem [shape: f32[32,1], index: 4, kind: input, shape index: {}]   ;;  %s913_s5 = inlined_call_operand.vmem [shape: f32[32,1], index: 5, kind: input, shape index: {}]   ;;  %s914_s3 = inlined_call_operand.vmem [shape: f32[32,32], index: 3, kind: input, shape index: {}]   ;;  %s915_s6 = inlined_call_operand.<no memory space> [shape: f32[1], index: 6, kind: input, shape index: {}]   ;;  %s916_s7 = inlined_call_operand.vmem [shape: f32[1,128], index: 7, kind: output, shape index: {}]  }
   0x1   :  { %v29_v0 = vld [vmem:[%s909_s0 + $0x10] sm:$0xff]  ;;  %v28_v1 = vld [vmem:[%s909_s0 + $0x8] sm:$0xff]  ;;  %v27_v2 = vld [vmem:[%s909_s0] sm:$0xff]  ;;  %711 = vset.pattern.permute.xlu1 %v713_v3  ;;  %710 = vset.pattern.permute.xlu0 %v713_v3 }
   0x2   :  { %v763_v4 = vand.u32 4294901760, %v29_v0  ;;  %v765_v5 = vand.u32 4294901760, %v28_v1  ;;  %v767_v6 = vand.u32 4294901760, %v27_v2  ;;  %v30_v7 = vld [vmem:[%s910_s1] sm:$0xff]  ;;  %v35_v8 = vld [vmem:[%s911_s2 + $0x8] sm:$0xff]  ;;  %712 = vset.pattern.permute.xlu2 %v713_v3  ;;  %v32_v12 = vld [vmem:[%s910_s1 + $0x10] sm:$0xff] }
   0x3   :  { %v31_v9 = vld [vmem:[%s910_s1 + $0x8] sm:$0xff]  ;;  %v60_v10 = vsel %vm58_vm0, %v30_v7, 0  ;;  %45 = vperm.xlu1 %711, %v35_v8   ;;  %v37_v13 = vld [vmem:[%s911_s2 + $0x18] sm:$0xff]  ;;  %v66_v19 = vsel %vm58_vm0, %v32_v12, 0  ;;  %v34_v29 = vld [vmem:[%s911_s2] sm:$0xff] }
   0x4   :  { %v63_v11 = vsel %vm58_vm0, %v31_v9, 0  ;;  %85 = vmatpush.msra.mxu0 %v763_v4  ;;  %v137_v14 = vsub.f32 %v29_v0, %v763_v4  ;;  %v143_v15 = vsub.f32 %v28_v1, %v765_v5  ;;  %228 = vmatpush.msra.mxu3 %v763_v4  ;;  %v149_v16 = vsub.f32 %v27_v2, %v767_v6  ;;  %v36_v35 = vld [vmem:[%s911_s2 + $0x10] sm:$0xff]  ;;  %v33_v38 = vld [vmem:[%s910_s1 + $0x18] sm:$0xff]  ;;  %v664_v53 = vld [vmem:[%s913_s5 + $0x8] sm:$0xff] }
   0x5   :  { %v791_v17 = vand.u32 4294901760, %v60_v10  ;;  %v793_v18 = vand.u32 4294901760, %v63_v11  ;;  %55 = vperm.xlu0 %710, %v37_v13   ;;  %v805_v30 = vand.u32 4294901760, %v66_v19  ;;  %v69_v41 = vsel %vm58_vm0, %v33_v38, 0  ;;  %v346_v49 = vld [vmem:[%s912_s4 + $0x10] sm:$0xff]  ;;  %v347_v51 = vld [vmem:[%s912_s4 + $0x18] sm:$0xff] }
   0x6   :  { %186 = vmatpush.msra.mxu2 %v137_v14  ;;  %87 = vmatpush.msra.mxu0 %v765_v5  ;;  %v138_v20 = vand.u32 4294901760, %v137_v14  ;;  %v144_v22 = vand.u32 4294901760, %v143_v15  ;;  %v150_v23 = vand.u32 4294901760, %v149_v16  ;;  %v114_v44 = vand.u32 4294901760, %v69_v41  ;;  %v665_v54 = vld [vmem:[%s913_s5 + $0x10] sm:$0xff] }
   0x7   :  { %v91_v21 = vsub.f32 %v60_v10, %v791_v17  ;;  %230 = vmatpush.msra.mxu3 %v765_v5  ;;  %v99_v24 = vsub.f32 %v63_v11, %v793_v18  ;;  %v107_v40 = vsub.f32 %v66_v19, %v805_v30 }
   0x8   :  { %189 = vmatpush.msra.mxu2 %v143_v15  ;;  %89 = vmatpush.msra.mxu0 %v767_v6  ;;  %v139_v25 = vsub.f32 %v137_v14, %v138_v20  ;;  %v145_v27 = vsub.f32 %v143_v15, %v144_v22  ;;  %v151_v28 = vsub.f32 %v149_v16, %v150_v23 }
   0x9   :  { %v92_v26 = vand.u32 4294901760, %v91_v21  ;;  %232 = vmatpush.msra.mxu3 %v767_v6  ;;  %v100_v34 = vand.u32 4294901760, %v99_v24  ;;  %v108_v43 = vand.u32 4294901760, %v107_v40  ;;  %v115_v46 = vsub.f32 %v69_v41, %v114_v44 }
   0xa   :  { %274 = vmatpush.msrb.mxu0 %v138_v20  ;;  %v140_v31 = vand.u32 4294901760, %v139_v25  ;;  %192 = vmatpush.msra.mxu2 %v149_v16  ;;  %v146_v33 = vand.u32 4294901760, %v145_v27  ;;  %v152_v37 = vand.u32 4294901760, %v151_v28 }
   0xb   :  { %v93_v32 = vsub.f32 %v91_v21, %v92_v26  ;;  %236 = vmatmul.f32.vlgmr.msra.gmra.mxu3 %v92_v26  ;;  %195 = vmatmul.f32.vlgmr.msra.gmra.mxu2 %v91_v21  ;;  %v101_v39 = vsub.f32 %v99_v24, %v100_v34  ;;  %v109_v45 = vsub.f32 %v107_v40, %v108_v43  ;;  %v116_v48 = vand.u32 4294901760, %v115_v46 }
   0xc   :  { %40 = vperm.xlu1 %711, %v34_v29   ;;  %141 = vmatpush.msra.mxu1 %v140_v31 }
   0xd   :  { %v94_v36 = vand.u32 4294901760, %v93_v32  ;;  %278 = vmatpush.msrb.mxu0 %v144_v22  ;;  %50 = vperm.xlu0 %710, %v36_v35   ;;  %v102_v42 = vand.u32 4294901760, %v101_v39  ;;  %v110_v47 = vand.u32 4294901760, %v109_v45  ;;  %v117_v50 = vsub.f32 %v115_v46, %v116_v48 }
   0xe   :  { %147 = vmatpush.msra.mxu1 %v146_v33 }
   0xf   :  { %95 = vmatmul.f32.vlgmr.msra.gmra.mxu0 %v94_v36  ;;  %v118_v52 = vand.u32 4294901760, %v117_v50 }
  0x10   :  { %282 = vmatpush.msrb.mxu0 %v150_v23  ;;  %153 = vmatpush.msra.mxu1 %v152_v37  ;;  %v340_v23 = vld [vmem:[%s914_s3] sm:$0xff] }
  0x11   :  { %155 = vmatmul.f32.vlgmr.msra.gmra.mxu1 %v791_v17  ;;  %v370_v32 = vsel %vm368_vm1, %v340_v23, 0 }
  0x12   :  { %314 = vmatpush.msrb.mxu1 %v763_v4  ;;  %v843_v39 = vand.u32 4294901760, %v370_v32 }
  0x13   :  { %242 = vmatmul.f32.gmra.mxu3 %v100_v34  ;;  %200 = vmatmul.f32.gmra.mxu2 %v99_v24 }
  0x14   :  { %316 = vmatpush.msrb.mxu1 %v765_v5  ;;  %365 = vperm.xlu1 %711, %v347_v51  }
  0x15   :  { %360 = vperm.xlu0 %710, %v346_v49  }
  0x16   :  { %318 = vmatpush.msrb.mxu1 %v767_v6 }
  0x17   :  { %103 = vmatmul.f32.gmra.mxu0 %v102_v42  ;;  %v341_v42 = vld [vmem:[%s914_s3 + $0x8] sm:$0xff] }
  0x18   :  { %v373_v50 = vsel %vm368_vm1, %v341_v42, 0 }
  0x19   :  { %159 = vmatmul.f32.gmra.mxu1 %v793_v18 }
  0x1b   :  { %248 = vmatmul.f32.gmra.mxu3 %v108_v43  ;;  %205 = vmatmul.f32.gmra.mxu2 %v107_v40 }
  0x1c   :  { %679 = vperm.xlu1 %711, %v665_v54  }
  0x1d   :  { %674 = vperm.xlu0 %710, %v664_v53  }
  0x1f   :  { %111 = vmatmul.f32.gmra.mxu0 %v110_v47 }
  0x21   :  { %163 = vmatmul.f32.gmra.mxu1 %v805_v30 }
  0x23   :  { %254 = vmatmul.f32.gmra.mxu3 %v116_v48  ;;  %210 = vmatmul.f32.gmra.mxu2 %v115_v46  ;;  %v402_v46 = vsub.f32 %v370_v32, %v843_v39  ;;  %v345_v32 = vld [vmem:[%s912_s4 + $0x8] sm:$0xff] }
  0x25   :  { %v403_v54 = vand.u32 4294901760, %v402_v46 }
  0x27   :  { %119 = vmatmul.f32.gmra.mxu0 %v118_v52 }
  0x29   :  { %167 = vmatmul.f32.gmra.mxu1 %v114_v44 }
  0x2f   :  { %284 = vmatmul.f32.vlgmr.msrb.gmra.mxu0 %v791_v17 }
  0x31   :  { %320 = vmatmul.f32.vlgmr.msrb.gmra.mxu1 %v791_v17 }
  0x37   :  { %288 = vmatmul.f32.gmra.mxu0 %v793_v18 }
  0x39   :  { %324 = vmatmul.f32.gmra.mxu1 %v793_v18 }
  0x3f   :  { %292 = vmatmul.f32.gmra.mxu0 %v805_v30 }
  0x41   :  { %328 = vmatmul.f32.gmra.mxu1 %v805_v30 }
  0x47   :  { %296 = vmatmul.f32.gmra.mxu0 %v114_v44 }
  0x49   :  { %332 = vmatmul.f32.gmra.mxu1 %v114_v44 }
  0x75   :  { %v46_v1 = vpop.permute.xlu1 %45 }
  0x77   :  { %v56_v63 = vpop.permute.xlu0 %55 }
  0x7e   :  { %v41_v7 = vpop.permute.xlu1 %40 }
  0x7f   :  { %v51_v6 = vpop.permute.xlu0 %50 }
  0x8c   :  { %v96_v55 = vpop.f32.mrf.mxu0 }
  0x8d   :  { %v97_v11 = vadd.f32 %v96_v55, %v41_v7  ;;  %v854_v55 = vand.u32 4294901760, %v373_v50 }
  0x8e   :  { %v156_v56 = vpop.f32.mrf.mxu1  ;;  %v196_v60 = vpop.f32.mrf.mxu2 }
  0x8f   :  { %v237_v62 = vpop.f32.mrf.mxu3  ;;  %v157_v16 = vadd.f32 %v156_v56, %v97_v11 }
  0x91   :  { %v197_v22 = vadd.f32 %v196_v60, %v157_v16 }
  0x93   :  { %v238_v29 = vadd.f32 %v237_v62, %v197_v22  ;;  %v404_v62 = vsub.f32 %v402_v46, %v403_v54 }
  0x94   :  { %v104_v57 = vpop.f32.mrf.mxu0 }
  0x95   :  { %v105_v9 = vadd.f32 %v104_v57, %v46_v1 }
  0x96   :  { %v160_v58 = vpop.f32.mrf.mxu1  ;;  %v201_v3 = vpop.f32.mrf.mxu2 }
  0x97   :  { %v243_v5 = vpop.f32.mrf.mxu3  ;;  %v161_v13 = vadd.f32 %v160_v58, %v105_v9 }
  0x99   :  { %v202_v19 = vadd.f32 %v201_v3, %v161_v13 }
  0x9b   :  { %v244_v24 = vadd.f32 %v243_v5, %v202_v19 }
  0x9c   :  { %v112_v59 = vpop.f32.mrf.mxu0 }
  0x9d   :  { %v113_v10 = vadd.f32 %v112_v59, %v51_v6  ;;  %v342_v59 = vld [vmem:[%s914_s3 + $0x10] sm:$0xff]  ;;  %v405_v6 = vand.u32 4294901760, %v404_v62 }
  0x9e   :  { %v164_v61 = vpop.f32.mrf.mxu1  ;;  %v206_v12 = vpop.f32.mrf.mxu2  ;;  %v376_v3 = vsel %vm368_vm1, %v342_v59, 0 }
  0x9f   :  { %v165_v14 = vadd.f32 %v164_v61, %v113_v10  ;;  %v249_v17 = vpop.f32.mrf.mxu3 }
  0xa1   :  { %v207_v20 = vadd.f32 %v206_v12, %v165_v14  ;;  %v343_v12 = vld [vmem:[%s914_s3 + $0x18] sm:$0xff] }
  0xa2   :  { %v379_v19 = vsel %vm368_vm1, %v343_v12, 0 }
  0xa3   :  { %v250_v25 = vadd.f32 %v249_v17, %v207_v20  ;;  %v425_v23 = vand.u32 4294901760, %v379_v19 }
  0xa4   :  { %v120_v0 = vpop.f32.mrf.mxu0 }
  0xa5   :  { %v121_v21 = vadd.f32 %v120_v0, %v56_v63  ;;  %v410_v63 = vsub.f32 %v373_v50, %v854_v55 }
  0xa6   :  { %v168_v2 = vpop.f32.mrf.mxu1  ;;  %v211_v28 = vpop.f32.mrf.mxu2 }
  0xa7   :  { %v169_v26 = vadd.f32 %v168_v2, %v121_v21  ;;  %v255_v38 = vpop.f32.mrf.mxu3  ;;  %v411_v7 = vand.u32 4294901760, %v410_v63 }
  0xa9   :  { %v212_v34 = vadd.f32 %v211_v28, %v169_v26  ;;  %v426_v26 = vsub.f32 %v379_v19, %v425_v23 }
  0xab   :  { %v256_v43 = vadd.f32 %v255_v38, %v212_v34  ;;  %v427_v28 = vand.u32 4294901760, %v426_v26  ;;  %v666_v34 = vld [vmem:[%s913_s5 + $0x18] sm:$0xff] }
  0xac   :  { %v285_v4 = vpop.f32.mrf.mxu0 }
  0xad   :  { %v286_v35 = vadd.f32 %v285_v4, %v238_v29  ;;  %v344_v29 = vld [vmem:[%s912_s4] sm:$0xff] }
  0xae   :  { %v321_v8 = vpop.f32.mrf.mxu1  ;;  %350 = vperm.xlu2 %712, %v344_v29  }
  0xaf   :  { %v322_v40 = vadd.f32 %v321_v8, %v286_v35  ;;  %v868_v8 = vand.u32 4294901760, %v376_v3 }
  0xb1   :  { %v336_v47 = vmax.f32 %v322_v40, 0.0  ;;  %v418_v16 = vsub.f32 %v376_v3, %v868_v8 }
  0xb3   :  { %v856_v56 = vand.u32 4294901760, %v336_v47  ;;  %v419_v22 = vand.u32 4294901760, %v418_v16 }
  0xb4   :  { %v289_v15 = vpop.f32.mrf.mxu0 }
  0xb5   :  { %v290_v30 = vadd.f32 %v289_v15, %v244_v24  ;;  %v465_v0 = vsub.f32 %v336_v47, %v856_v56  ;;  %v412_v15 = vsub.f32 %v410_v63, %v411_v7 }
  0xb6   :  { %v325_v18 = vpop.f32.mrf.mxu1  ;;  %355 = vperm.xlu2 %712, %v345_v32  }
  0xb7   :  { %v326_v36 = vadd.f32 %v325_v18, %v290_v30  ;;  %v466_v11 = vand.u32 4294901760, %v465_v0  ;;  %v413_v21 = vand.u32 4294901760, %v412_v15  ;;  %v428_v30 = vsub.f32 %v426_v26, %v427_v28 }
  0xb9   :  { %v337_v44 = vmax.f32 %v326_v36, 0.0  ;;  %v467_v18 = vsub.f32 %v465_v0, %v466_v11 }
  0xbb   :  { %v852_v52 = vand.u32 4294901760, %v337_v44  ;;  %v468_v24 = vand.u32 4294901760, %v467_v18 }
  0xbc   :  { %v293_v27 = vpop.f32.mrf.mxu0 }
  0xbd   :  { %v294_v31 = vadd.f32 %v293_v27, %v250_v25  ;;  %v459_v60 = vsub.f32 %v337_v44, %v852_v52  ;;  %v420_v25 = vsub.f32 %v418_v16, %v419_v22 }
  0xbe   :  { %v329_v33 = vpop.f32.mrf.mxu1 }
  0xbf   :  { %v330_v37 = vadd.f32 %v329_v33, %v294_v31  ;;  %v460_v5 = vand.u32 4294901760, %v459_v60  ;;  %v421_v27 = vand.u32 4294901760, %v420_v25  ;;  %v429_v31 = vand.u32 4294901760, %v428_v30  ;;  %v663_v33 = vld [vmem:[%s913_s5] sm:$0xff] }
  0xc0   :  { %669 = vperm.xlu2 %712, %v663_v33  }
  0xc1   :  { %v338_v41 = vmax.f32 %v330_v37, 0.0  ;;  %v461_v14 = vsub.f32 %v459_v60, %v460_v5 }
  0xc3   :  { %v849_v48 = vand.u32 4294901760, %v338_v41  ;;  %v462_v20 = vand.u32 4294901760, %v461_v14 }
  0xc4   :  { %v297_v45 = vpop.f32.mrf.mxu0 }
  0xc5   :  { %v298_v49 = vadd.f32 %v297_v45, %v256_v43  ;;  %v453_v57 = vsub.f32 %v338_v41, %v849_v48 }
  0xc6   :  { %v333_v51 = vpop.f32.mrf.mxu1 }
  0xc7   :  { %v334_v53 = vadd.f32 %v333_v51, %v298_v49  ;;  %v454_v2 = vand.u32 4294901760, %v453_v57 }
  0xc8   :  { %684 = vperm.xlu2 %712, %v666_v34  }
  0xc9   :  { %v339_v58 = vmax.f32 %v334_v53, 0.0  ;;  %v455_v10 = vsub.f32 %v453_v57, %v454_v2 }
  0xcb   :  { %v393_v61 = vand.u32 4294901760, %v339_v58  ;;  %v456_v17 = vand.u32 4294901760, %v455_v10 }
  0xcd   :  { %v447_v1 = vsub.f32 %v339_v58, %v393_v61  ;;  %394 = vmatpush.msrb.mxu2 %v393_v61  ;;  %545 = vmatpush.msra.mxu1 %v393_v61 }
  0xcf   :  { %396 = vmatpush.msrb.mxu2 %v849_v48  ;;  %501 = vmatpush.msra.mxu0 %v447_v1  ;;  %v448_v4 = vand.u32 4294901760, %v447_v1 }
  0xd0   :  { %547 = vmatpush.msra.mxu1 %v849_v48 }
  0xd1   :  { %398 = vmatpush.msrb.mxu2 %v852_v52  ;;  %504 = vmatpush.msra.mxu0 %v453_v57  ;;  %v449_v9 = vsub.f32 %v447_v1, %v448_v4  ;;  %v366_v1 = vpop.permute.xlu1 %365 }
  0xd2   :  { %549 = vmatpush.msra.mxu1 %v852_v52 }
  0xd3   :  { %400 = vmatpush.msrb.mxu2 %v856_v56  ;;  %507 = vmatpush.msra.mxu0 %v459_v60  ;;  %v450_v13 = vand.u32 4294901760, %v449_v9 }
  0xd4   :  { %551 = vmatpush.msra.mxu1 %v856_v56  ;;  %406 = vmatmul.f32.vlgmr.msrb.gmra.mxu2 %v405_v6 }
  0xd5   :  { %592 = vmatpush.msra.mxu2 %v448_v4  ;;  %451 = vmatpush.msrb.mxu3 %v450_v13 }
  0xd6   :  { %510 = vmatpush.msra.mxu0 %v465_v0  ;;  %555 = vmatmul.f32.vlgmr.msra.gmra.mxu1 %v403_v54  ;;  %v361_v54 = vpop.permute.xlu0 %360 }
  0xd7   :  { %596 = vmatpush.msra.mxu2 %v454_v2  ;;  %457 = vmatpush.msrb.mxu3 %v456_v17 }
  0xd8   :  { %513 = vmatmul.f32.vlgmr.msra.gmra.mxu0 %v402_v46 }
  0xd9   :  { %600 = vmatpush.msra.mxu2 %v460_v5  ;;  %463 = vmatpush.msrb.mxu3 %v462_v20 }
  0xdb   :  { %604 = vmatpush.msra.mxu2 %v466_v11  ;;  %469 = vmatpush.msrb.mxu3 %v468_v24 }
  0xdc   :  { %414 = vmatmul.f32.gmra.mxu2 %v413_v21  ;;  %471 = vmatmul.f32.vlgmr.msrb.gmra.mxu3 %v843_v39 }
  0xdd   :  { %635 = vmatpush.msra.mxu3 %v393_v61 }
  0xde   :  { %561 = vmatmul.f32.gmra.mxu1 %v411_v7  ;;  %v675_v24 = vpop.permute.xlu0 %674 }
  0xdf   :  { %637 = vmatpush.msra.mxu3 %v849_v48 }
  0xe0   :  { %518 = vmatmul.f32.gmra.mxu0 %v410_v63 }
  0xe1   :  { %639 = vmatpush.msra.mxu3 %v852_v52 }
  0xe3   :  { %641 = vmatpush.msra.mxu3 %v856_v56 }
  0xe4   :  { %422 = vmatmul.f32.gmra.mxu2 %v421_v27  ;;  %475 = vmatmul.f32.gmra.mxu3 %v854_v55  ;;  %v680_v27 = vpop.permute.xlu1 %679 }
  0xe6   :  { %567 = vmatmul.f32.gmra.mxu1 %v419_v22 }
  0xe8   :  { %523 = vmatmul.f32.gmra.mxu0 %v418_v16 }
  0xec   :  { %430 = vmatmul.f32.gmra.mxu2 %v429_v31  ;;  %479 = vmatmul.f32.gmra.mxu3 %v868_v8 }
  0xee   :  { %573 = vmatmul.f32.gmra.mxu1 %v427_v28 }
  0xf0   :  { %528 = vmatmul.f32.gmra.mxu0 %v426_v26 }
  0xf4   :  { %483 = vmatmul.f32.gmra.mxu3 %v425_v23  ;;  %606 = vmatmul.f32.vlgmr.msra.gmra.mxu2 %v843_v39 }
  0xfc   :  { %610 = vmatmul.f32.gmra.mxu2 %v854_v55  ;;  %643 = vmatmul.f32.vlgmr.msra.gmra.mxu3 %v843_v39 }
 0x104   :  { %614 = vmatmul.f32.gmra.mxu2 %v868_v8  ;;  %647 = vmatmul.f32.gmra.mxu3 %v854_v55 }
 0x108   :  { %v351_v44 = vpop.permute.xlu2 %350 }
 0x10c   :  { %618 = vmatmul.f32.gmra.mxu2 %v425_v23  ;;  %651 = vmatmul.f32.gmra.mxu3 %v868_v8 }
 0x110   :  { %v356_v48 = vpop.permute.xlu2 %355 }
 0x114   :  { %655 = vmatmul.f32.gmra.mxu3 %v425_v23 }
 0x11a   :  { %v670_v18 = vpop.permute.xlu2 %669 }
 0x122   :  { %v685_v34 = vpop.permute.xlu2 %684 }
 0x153   :  { %v556_v45 = vpop.f32.mrf.mxu1 }
 0x155   :  { %v514_v41 = vpop.f32.mrf.mxu0 }
 0x157   :  { %v407_v35 = vpop.f32.mrf.mxu2 }
 0x158   :  { %v408_v53 = vadd.f32 %v407_v35, %v351_v44  ;;  %v701_v44 = vstv %s915_s6 }
 0x15b   :  { %v562_v49 = vpop.f32.mrf.mxu1 }
 0x15d   :  { %v519_v47 = vpop.f32.mrf.mxu0 }
 0x15f   :  { %v415_v36 = vpop.f32.mrf.mxu2  ;;  %v472_v37 = vpop.f32.mrf.mxu3 }
 0x160   :  { %v416_v50 = vadd.f32 %v415_v36, %v356_v48  ;;  %v473_v59 = vadd.f32 %v472_v37, %v408_v53 }
 0x162   :  { %v515_v0 = vadd.f32 %v514_v41, %v473_v59 }
 0x163   :  { %v568_v61 = vpop.f32.mrf.mxu1 }
 0x164   :  { %v557_v7 = vadd.f32 %v556_v45, %v515_v0 }
 0x165   :  { %v524_v57 = vpop.f32.mrf.mxu0 }
 0x167   :  { %v423_v38 = vpop.f32.mrf.mxu2  ;;  %v476_v40 = vpop.f32.mrf.mxu3 }
 0x168   :  { %v424_v55 = vadd.f32 %v423_v38, %v361_v54  ;;  %v477_v56 = vadd.f32 %v476_v40, %v416_v50 }
 0x16a   :  { %v520_v60 = vadd.f32 %v519_v47, %v477_v56 }
 0x16b   :  { %v574_v17 = vpop.f32.mrf.mxu1 }
 0x16c   :  { %v563_v4 = vadd.f32 %v562_v49, %v520_v60 }
 0x16d   :  { %v529_v9 = vpop.f32.mrf.mxu0 }
 0x16f   :  { %v431_v42 = vpop.f32.mrf.mxu2  ;;  %v480_v43 = vpop.f32.mrf.mxu3 }
 0x170   :  { %v481_v58 = vadd.f32 %v480_v43, %v424_v55  ;;  %v432_v3 = vadd.f32 %v431_v42, %v366_v1 }
 0x172   :  { %v525_v63 = vadd.f32 %v524_v57, %v481_v58 }
 0x174   :  { %v569_v5 = vadd.f32 %v568_v61, %v525_v63 }
 0x177   :  { %v484_v39 = vpop.f32.mrf.mxu3  ;;  %v607_v46 = vpop.f32.mrf.mxu2 }
 0x178   :  { %v485_v6 = vadd.f32 %v484_v39, %v432_v3  ;;  %v608_v10 = vadd.f32 %v607_v46, %v557_v7 }
 0x17a   :  { %v530_v14 = vadd.f32 %v529_v9, %v485_v6 }
 0x17c   :  { %v575_v21 = vadd.f32 %v574_v17, %v530_v14 }
 0x17f   :  { %v611_v51 = vpop.f32.mrf.mxu2  ;;  %v644_v52 = vpop.f32.mrf.mxu3 }
 0x180   :  { %v612_v8 = vadd.f32 %v611_v51, %v563_v4  ;;  %v645_v15 = vadd.f32 %v644_v52, %v608_v10 }
 0x182   :  { %v659_v22 = vmax.f32 %v645_v15, 0.0 }
 0x184   :  { %v687_v29 = vmul.f32 %v670_v18, %v659_v22 }
 0x187   :  { %v648_v62 = vpop.f32.mrf.mxu3  ;;  %v615_v2 = vpop.f32.mrf.mxu2 }
 0x188   :  { %v616_v11 = vadd.f32 %v615_v2, %v569_v5  ;;  %v649_v12 = vadd.f32 %v648_v62, %v612_v8 }
 0x18a   :  { %v660_v19 = vmax.f32 %v649_v12, 0.0 }
 0x18c   :  { %v688_v25 = vmul.f32 %v675_v24, %v660_v19 }
 0x18e   :  { %v691_v32 = vadd.f32 %v688_v25, %v687_v29 }
 0x18f   :  { %v652_v13 = vpop.f32.mrf.mxu3  ;;  %v619_v20 = vpop.f32.mrf.mxu2 }
 0x190   :  { %v653_v16 = vadd.f32 %v652_v13, %v616_v11  ;;  %v620_v26 = vadd.f32 %v619_v20, %v575_v21 }
 0x192   :  { %v661_v23 = vmax.f32 %v653_v16, 0.0 }
 0x194   :  { %v689_v30 = vmul.f32 %v680_v27, %v661_v23 }
 0x196   :  { %v692_v36 = vadd.f32 %v691_v32, %v689_v30 }
 0x197   :  { %v656_v28 = vpop.f32.mrf.mxu3 }
 0x198   :  { %v657_v31 = vadd.f32 %v656_v28, %v620_v26 }
 0x19a   :  { %v662_v33 = vmax.f32 %v657_v31, 0.0 }
 0x19c   :  { %v690_v35 = vmul.f32 %v685_v34, %v662_v33 }
 0x19e   :  { %v693_v37 = vadd.f32 %v692_v36, %v690_v35 }
 0x1a0   :  { %v694_v38 = vrot.slane %v693_v37, 4 }
 0x1a2   :  { %v695_v40 = vadd.f32 %v694_v38, %v693_v37 }
 0x1a4   :  { %v696_v41 = vrot.slane %v695_v40, 2 }
 0x1a6   :  { %v697_v42 = vadd.f32 %v696_v41, %v695_v40 }
 0x1a8   :  { %v698_v43 = vrot.slane %v697_v42, 1 }
 0x1aa   :  { %v699_v45 = vadd.f32 %v698_v43, %v697_v42 }
 0x1ac   :  { %v702_v39 = vadd.f32 %v701_v44, %v699_v45 }
 0x1ae   :  { %v703_v46 = vmax.f32 %v702_v39, 0.0 }
 0x1b0   :  { %704 = vst [vmem:[%s916_s7] sm:$0x1] %v703_v46 }

</bundles_post_ra>
